<compile_context>
chip_gen: v5e
topology: v5e:2x2
jax: 0.10.0
libtpu: 0.0.40
codegen_flags: <defaults>
</compile_context>

<pallas_src>
import jax
import jax.numpy as jnp
from jax.experimental import pallas as pl
from jax.experimental.pallas import tpu as pltpu


def mlp_kernel(x_ref, w1_ref, b1_ref, w2_ref, b2_ref, o_ref):
    # x_ref : (TB, IN)   streamed input tile (f32 or bf16)
    # w1_ref: (IN, H)    first-layer weight, pre-transposed, same dtype as x
    # b1_ref: (1, H)     first-layer bias (f32)
    # w2_ref: (1, H)     second-layer weight row (torch layout, f32)
    # b2_ref: (1,)       second-layer bias, scalar in SMEM (f32)
    # o_ref : (1, TB)    lane-dense output row for this tile
    h = jnp.dot(x_ref[...], w1_ref[...], preferred_element_type=jnp.float32)
    h = jnp.maximum(h + b1_ref[...], 0.0)                   # bias + ReLU (VPU)
    # H -> 1 projection on VPU/XLU: elementwise multiply by w2 row, reduce H.
    y = jnp.sum(h * w2_ref[...], axis=-1) + b2_ref[0]       # (TB,)
    o_ref[...] = y.reshape(1, -1).astype(o_ref.dtype)       # lane-dense store


def _choose_batch_tile(B, cap=2048):
    """Pick the batch tile.

    B < 256: single tile (the lane-dense (1, tb) output block forces tb to be a
    multiple of 128 or the full batch, so splitting tiny batches is illegal).
    B >= 256: among multiples of 128 that give >= 2 tiles, prefer (even grid,
    exact divisor, large tile) in that order -> balanced work on v7x's two
    TensorCores and minimal per-step overhead.
    """
    if B < 256:
        return B
    max_tb = max(128, min(cap, (B // 2) // 128 * 128))
    best_tb, best_key = max_tb, (False, False, 0)
    for tb in range(128, max_tb + 1, 128):
        g = -(-B // tb)
        key = (g % 2 == 0, B % tb == 0, tb)
        if key > best_key:
            best_tb, best_key = tb, key
    return best_tb


def _x_block_spec(tb, in_dim, grid_b):
    """x BlockSpec; deepen the input pipeline when the grid is long enough."""
    index_map = lambda i: (i, 0)
    if grid_b >= 3 and hasattr(pl, "Buffered"):
        try:
            return pl.BlockSpec((tb, in_dim), index_map,
                                pipeline_mode=pl.Buffered(3))
        except Exception:  # older/newer API surface: fall back to default 2-deep
            pass
    return pl.BlockSpec((tb, in_dim), index_map)


def nn_forward(x, w1, b1, w2, b2, *, tb=None, cast_bf16=False):
    """x: (B, in_dim) f32 or bf16.  w1: (hidden, in_dim), b1: (hidden,),
    w2: (1, hidden), b2: (1,)  -- same conventions as torch.nn.Linear.

    For best HBM-bandwidth use, pass x already in bf16 (cast fused into the
    upstream producer); cast_bf16=True forces a cast here but that costs an
    extra HBM pass over x and is therefore off by default.
    """
    B, in_dim = x.shape
    hidden = w1.shape[0]
    out_dtype = x.dtype

    compute_dtype = x.dtype
    if cast_bf16 and compute_dtype == jnp.float32:
        # NOTE: separate XLA pass over x in HBM; prefer passing bf16 x directly.
        x = x.astype(jnp.bfloat16)
        compute_dtype = jnp.bfloat16

    if tb is None:
        tb = _choose_batch_tile(B)
    grid_b = pl.cdiv(B, tb)

    # Parameter glue (outside the kernel; weights are tiny so casts are cheap).
    w1t = w1.T.astype(compute_dtype)     # (in_dim, hidden), streamed dtype
    b1r = b1.reshape(1, hidden).astype(jnp.float32)
    w2r = w2.reshape(1, hidden).astype(jnp.float32)
    b2r = b2.reshape(1).astype(jnp.float32)   # -> SMEM scalar

    out_row = pl.pallas_call(
        mlp_kernel,
        out_shape=jax.ShapeDtypeStruct((1, B), out_dtype),
        grid_spec=pltpu.PrefetchScalarGridSpec(
            num_scalar_prefetch=0,
            grid=(grid_b,),
            in_specs=[
                _x_block_spec(tb, in_dim, grid_b),
                pl.BlockSpec((in_dim, hidden), lambda i: (0, 0)),
                pl.BlockSpec((1, hidden), lambda i: (0, 0)),
                pl.BlockSpec((1, hidden), lambda i: (0, 0)),
                pl.BlockSpec(memory_space=pltpu.MemorySpace.SMEM),
            ],
            out_specs=pl.BlockSpec((1, tb), lambda i: (0, i)),
        ),
        compiler_params=pltpu.CompilerParams(
            dimension_semantics=("parallel",),
            # tb=2048 double/triple-buffered x (~16-24 MiB) overshoots v5e's
            # 16 MiB scoped default; 40 MiB is safe on v5e/v6e (128 MiB
            # physical) and v7x (64 MiB physical).
            vmem_limit_bytes=40 << 20,
        ),
    )(x, w1t, b1r, w2r, b2r)

    return out_row[0, :].reshape(B, 1)


def _reference(x, w1, b1, w2, b2):
    return jnp.maximum(x @ w1.T + b1, 0.0) @ w2.T + b2


if __name__ == "__main__":
    IN_DIM = 768 + 256   # 1024
    HIDDEN = 32

    key = jax.random.PRNGKey(0)
    kx, k1, k2, k3, k4, kx2, kx3 = jax.random.split(key, 7)

    # Deterministic parameter init (torch.nn.Linear-style uniform bounds).
    bound1 = 1.0 / jnp.sqrt(IN_DIM)
    bound2 = 1.0 / jnp.sqrt(HIDDEN)
    w1 = jax.random.uniform(k1, (HIDDEN, IN_DIM), jnp.float32, -bound1, bound1)
    b1 = jax.random.uniform(k2, (HIDDEN,), jnp.float32, -bound1, bound1)
    w2 = jax.random.uniform(k3, (1, HIDDEN), jnp.float32, -bound2, bound2)
    b2 = jax.random.uniform(k4, (1,), jnp.float32, -bound2, bound2)

    # 1) Small single-tile case (tb == B, full-array-dim layout exception).
    B = 8
    x = jax.random.normal(kx, (B, IN_DIM), jnp.float32)
    out = jax.block_until_ready(nn_forward(x, w1, b1, w2, b2))
    ref = _reference(x, w1, b1, w2, b2)
    assert out.shape == (B, 1)
    assert jnp.allclose(out, ref, atol=1e-4, rtol=1e-4)

    # 2) Ragged batch: grid = cdiv(300, 128) = 3, NO jnp.pad, masked tail
    #    store on the partial last block; also exercises Buffered(3) on x.
    B2 = 300
    x2 = jax.random.normal(kx2, (B2, IN_DIM), jnp.float32)
    out2 = jax.block_until_ready(nn_forward(x2, w1, b1, w2, b2))
    ref2 = _reference(x2, w1, b1, w2, b2)
    assert out2.shape == (B2, 1)
    assert jnp.allclose(out2, ref2, atol=1e-4, rtol=1e-4)

    # 3) bf16 streaming path (caller supplies bf16 x; f32 MXU accumulation):
    #    tb = 256 exact divisor -> balanced grid of 2.
    B3 = 512
    x3 = jax.random.normal(kx3, (B3, IN_DIM), jnp.float32).astype(jnp.bfloat16)
    out3 = jax.block_until_ready(nn_forward(x3, w1, b1, w2, b2))
    ref3 = _reference(x3.astype(jnp.float32), w1, b1, w2, b2)
    assert out3.shape == (B3, 1)
    assert jnp.allclose(out3.astype(jnp.float32), ref3, atol=5e-2, rtol=5e-2)

    print("KERNEL_OK")
</pallas_src>

<mosaic_0001>
module attributes {stable_mosaic.version = 11 : i64} {
  func.func @mlp_kernel(%arg0: i32, %arg1: memref<8x1024xf32, #tpu.memory_space<vmem>>, %arg2: memref<1024x32xf32, #tpu.memory_space<vmem>>, %arg3: memref<1x32xf32, #tpu.memory_space<vmem>>, %arg4: memref<1x32xf32, #tpu.memory_space<vmem>>, %arg5: memref<1xf32, #tpu.memory_space<smem>>, %arg6: memref<1x8xf32, #tpu.memory_space<vmem>>) attributes {dimension_semantics = [#tpu.dimension_semantics<parallel>], iteration_bounds = array<i64: 1>, scalar_prefetch = 0 : i64, scratch_operands = 0 : i64, tpu.core_type = #tpu.core_type<tc>, window_params = [{transform_indices = @transform_0, window_bounds = array<i64: 8, 1024>}, {pipeline_mode = #tpu.pipeline_mode<synchronous>, transform_indices = @transform_1, window_bounds = array<i64: 1024, 32>}, {pipeline_mode = #tpu.pipeline_mode<synchronous>, transform_indices = @transform_2, window_bounds = array<i64: 1, 32>}, {pipeline_mode = #tpu.pipeline_mode<synchronous>, transform_indices = @transform_3, window_bounds = array<i64: 1, 32>}, {transform_indices = @transform_4, window_bounds = array<i64: 1>}, {transform_indices = @transform_5, window_bounds = array<i64: 1, 8>}]} {
    %c0 = arith.constant 0 : index
    %c0_0 = arith.constant 0 : index
    %0 = vector.load %arg1[%c0, %c0_0] : memref<8x1024xf32, #tpu.memory_space<vmem>>, vector<8x1024xf32>
    %c0_1 = arith.constant 0 : index
    %c0_2 = arith.constant 0 : index
    %1 = vector.load %arg2[%c0_1, %c0_2] : memref<1024x32xf32, #tpu.memory_space<vmem>>, vector<1024x32xf32>
    %cst = arith.constant dense<0.000000e+00> : vector<8x32xf32>
    %2 = tpu.matmul %0, %1, %cst {dimension_numbers = #tpu.dot_dimension_numbers<[1], [0], [0], [1], [0, 0, 1, 1], [], []>} : vector<8x1024xf32>, vector<1024x32xf32>, vector<8x32xf32> -> vector<8x32xf32>
    %c0_3 = arith.constant 0 : index
    %c0_4 = arith.constant 0 : index
    %3 = vector.load %arg3[%c0_3, %c0_4] : memref<1x32xf32, #tpu.memory_space<vmem>>, vector<1x32xf32>
    %4 = vector.broadcast %3 : vector<1x32xf32> to vector<8x32xf32>
    %5 = arith.addf %2, %4 : vector<8x32xf32>
    %cst_5 = arith.constant 0.000000e+00 : f32
    %6 = vector.broadcast %cst_5 : f32 to vector<8x32xf32>
    %7 = arith.maximumf %5, %6 : vector<8x32xf32>
    %c0_6 = arith.constant 0 : index
    %c0_7 = arith.constant 0 : index
    %8 = vector.load %arg4[%c0_6, %c0_7] : memref<1x32xf32, #tpu.memory_space<vmem>>, vector<1x32xf32>
    %9 = vector.broadcast %8 : vector<1x32xf32> to vector<8x32xf32>
    %10 = arith.mulf %7, %9 : vector<8x32xf32>
    %cst_8 = arith.constant dense<0.000000e+00> : vector<8xf32>
    %11 = vector.multi_reduction <add>, %10, %cst_8 [1] : vector<8x32xf32> to vector<8xf32>
    %c0_9 = arith.constant 0 : index
    %12 = memref.load %arg5[%c0_9] : memref<1xf32, #tpu.memory_space<smem>>
    %13 = vector.broadcast %12 : f32 to vector<8xf32>
    %14 = arith.addf %11, %13 : vector<8xf32>
    %15 = vector.shape_cast %14 : vector<8xf32> to vector<1x8xf32>
    %c0_10 = arith.constant 0 : index
    %c0_11 = arith.constant 0 : index
    %16 = vector.load %arg6[%c0_10, %c0_11] : memref<1x8xf32, #tpu.memory_space<vmem>>, vector<1x8xf32>
    tpu.vector_store %arg6[%c0_10, %c0_11], %15 {strides = array<i32>} : memref<1x8xf32, #tpu.memory_space<vmem>>, vector<1x8xf32>,
    return
  }
  func.func @transform_0(%arg0: i32) -> (i32, i32) {
    %c0_i32 = arith.constant 0 : i32
    %c0_i32_0 = arith.constant 0 : i32
    return %arg0, %c0_i32 : i32, i32
  }
  func.func @transform_1(%arg0: i32) -> (i32, i32) {
    %c0_i32 = arith.constant 0 : i32
    %c0_i32_0 = arith.constant 0 : i32
    %c0_i32_1 = arith.constant 0 : i32
    return %c0_i32, %c0_i32_0 : i32, i32
  }
  func.func @transform_2(%arg0: i32) -> (i32, i32) {
    %c0_i32 = arith.constant 0 : i32
    %c0_i32_0 = arith.constant 0 : i32
    %c0_i32_1 = arith.constant 0 : i32
    return %c0_i32, %c0_i32_0 : i32, i32
  }
  func.func @transform_3(%arg0: i32) -> (i32, i32) {
    %c0_i32 = arith.constant 0 : i32
    %c0_i32_0 = arith.constant 0 : i32
    %c0_i32_1 = arith.constant 0 : i32
    return %c0_i32, %c0_i32_0 : i32, i32
  }
  func.func @transform_4(%arg0: i32) -> i32 {
    %c0_i32 = arith.constant 0 : i32
    %c0_i32_0 = arith.constant 0 : i32
    return %c0_i32 : i32
  }
  func.func @transform_5(%arg0: i32) -> (i32, i32) {
    %c0_i32 = arith.constant 0 : i32
    %c0_i32_0 = arith.constant 0 : i32
    return %c0_i32, %arg0 : i32, i32
  }
}

</mosaic_0001>

<bundles_post_ra>
// kernel: tpu_custom_call.1
= control target key start
LH: loop header
LB: loop body
LE: loop exit
PB: predicated region body
PF: predicated region fallthrough
CT: control target
= control target key end

     0   :  { %s838_s0 = inlined_call_operand.vmem [shape: f32[8,1024], index: 0, kind: input, shape index: {}]   ;;  %s839_s1 = inlined_call_operand.vmem [shape: f32[1024,32], index: 1, kind: input, shape index: {}]   ;;  %s840_s2 = inlined_call_operand.vmem [shape: f32[1,32], index: 2, kind: input, shape index: {}]   ;;  %s841_s3 = inlined_call_operand.vmem [shape: f32[1,32], index: 3, kind: input, shape index: {}]   ;;  %s842_s4 = inlined_call_operand.<no memory space> [shape: f32[1], index: 4, kind: input, shape index: {}]   ;;  %s843_s5 = inlined_call_operand.hbm [shape: f32[1,8], index: 5, kind: output, shape index: {}]  }
   0x1   :  { %v77_v0 = vld [vmem:[%s839_s1 + $0x178] sm:$0xff]  ;;  %v76_v2 = vld [vmem:[%s839_s1 + $0x170] sm:$0xff]  ;;  %v75_v6 = vld [vmem:[%s839_s1 + $0x168] sm:$0xff] }
   0x2   :  { %v45_v1 = vld [vmem:[%s839_s1 + $0x78] sm:$0xff]  ;;  %202 = vmatpush.msra.mxu2 %v77_v0  ;;  %v44_v4 = vld [vmem:[%s839_s1 + $0x70] sm:$0xff]  ;;  %v43_v8 = vld [vmem:[%s839_s1 + $0x68] sm:$0xff] }
   0x3   :  { %162 = vmatpush.msra.mxu0 %v45_v1  ;;  %v93_v3 = vld [vmem:[%s839_s1 + $0x1f8] sm:$0xff]  ;;  %v92_v7 = vld [vmem:[%s839_s1 + $0x1f0] sm:$0xff]  ;;  %v91_v10 = vld [vmem:[%s839_s1 + $0x1e8] sm:$0xff] }
   0x4   :  { %v61_v5 = vld [vmem:[%s839_s1 + $0xf8] sm:$0xff]  ;;  %222 = vmatpush.msra.mxu3 %v93_v3  ;;  %203 = vmatpush.msra.mxu2 %v76_v2  ;;  %v60_v9 = vld [vmem:[%s839_s1 + $0xf0] sm:$0xff]  ;;  %v74_v11 = vld [vmem:[%s839_s1 + $0x160] sm:$0xff] }
   0x5   :  { %182 = vmatpush.msra.mxu1 %v61_v5  ;;  %163 = vmatpush.msra.mxu0 %v44_v4  ;;  %v42_v12 = vld [vmem:[%s839_s1 + $0x60] sm:$0xff]  ;;  %v59_v13 = vld [vmem:[%s839_s1 + $0xe8] sm:$0xff]  ;;  %v73_v16 = vld [vmem:[%s839_s1 + $0x158] sm:$0xff] }
   0x6   :  { %223 = vmatpush.msra.mxu3 %v92_v7  ;;  %204 = vmatpush.msra.mxu2 %v75_v6  ;;  %v90_v14 = vld [vmem:[%s839_s1 + $0x1e0] sm:$0xff]  ;;  %v41_v17 = vld [vmem:[%s839_s1 + $0x58] sm:$0xff]  ;;  %v72_v20 = vld [vmem:[%s839_s1 + $0x150] sm:$0xff] }
   0x7   :  { %183 = vmatpush.msra.mxu1 %v60_v9  ;;  %164 = vmatpush.msra.mxu0 %v43_v8  ;;  %v58_v15 = vld [vmem:[%s839_s1 + $0xe0] sm:$0xff]  ;;  %v89_v18 = vld [vmem:[%s839_s1 + $0x1d8] sm:$0xff]  ;;  %v40_v21 = vld [vmem:[%s839_s1 + $0x50] sm:$0xff] }
   0x8   :  { %224 = vmatpush.msra.mxu3 %v91_v10  ;;  %205 = vmatpush.msra.mxu2 %v74_v11  ;;  %v57_v19 = vld [vmem:[%s839_s1 + $0xd8] sm:$0xff]  ;;  %v88_v22 = vld [vmem:[%s839_s1 + $0x1d0] sm:$0xff]  ;;  %v71_v24 = vld [vmem:[%s839_s1 + $0x148] sm:$0xff] }
   0x9   :  { %184 = vmatpush.msra.mxu1 %v59_v13  ;;  %165 = vmatpush.msra.mxu0 %v42_v12  ;;  %v56_v23 = vld [vmem:[%s839_s1 + $0xd0] sm:$0xff]  ;;  %v39_v25 = vld [vmem:[%s839_s1 + $0x48] sm:$0xff]  ;;  %v70_v28 = vld [vmem:[%s839_s1 + $0x140] sm:$0xff] }
   0xa   :  { %225 = vmatpush.msra.mxu3 %v90_v14  ;;  %206 = vmatpush.msra.mxu2 %v73_v16  ;;  %v87_v26 = vld [vmem:[%s839_s1 + $0x1c8] sm:$0xff]  ;;  %v38_v29 = vld [vmem:[%s839_s1 + $0x40] sm:$0xff]  ;;  %v69_v32 = vld [vmem:[%s839_s1 + $0x138] sm:$0xff] }
   0xb   :  { %185 = vmatpush.msra.mxu1 %v58_v15  ;;  %166 = vmatpush.msra.mxu0 %v41_v17  ;;  %v55_v27 = vld [vmem:[%s839_s1 + $0xc8] sm:$0xff]  ;;  %v86_v30 = vld [vmem:[%s839_s1 + $0x1c0] sm:$0xff]  ;;  %v37_v33 = vld [vmem:[%s839_s1 + $0x38] sm:$0xff] }
   0xc   :  { %226 = vmatpush.msra.mxu3 %v89_v18  ;;  %207 = vmatpush.msra.mxu2 %v72_v20  ;;  %v54_v31 = vld [vmem:[%s839_s1 + $0xc0] sm:$0xff]  ;;  %v85_v34 = vld [vmem:[%s839_s1 + $0x1b8] sm:$0xff]  ;;  %v68_v36 = vld [vmem:[%s839_s1 + $0x130] sm:$0xff] }
   0xd   :  { %186 = vmatpush.msra.mxu1 %v57_v19  ;;  %167 = vmatpush.msra.mxu0 %v40_v21  ;;  %v53_v35 = vld [vmem:[%s839_s1 + $0xb8] sm:$0xff]  ;;  %v36_v37 = vld [vmem:[%s839_s1 + $0x30] sm:$0xff]  ;;  %v67_v40 = vld [vmem:[%s839_s1 + $0x128] sm:$0xff] }
   0xe   :  { %227 = vmatpush.msra.mxu3 %v88_v22  ;;  %208 = vmatpush.msra.mxu2 %v71_v24  ;;  %v84_v38 = vld [vmem:[%s839_s1 + $0x1b0] sm:$0xff]  ;;  %v35_v41 = vld [vmem:[%s839_s1 + $0x28] sm:$0xff]  ;;  %v66_v44 = vld [vmem:[%s839_s1 + $0x120] sm:$0xff] }
   0xf   :  { %187 = vmatpush.msra.mxu1 %v56_v23  ;;  %168 = vmatpush.msra.mxu0 %v39_v25  ;;  %v52_v39 = vld [vmem:[%s839_s1 + $0xb0] sm:$0xff]  ;;  %v83_v42 = vld [vmem:[%s839_s1 + $0x1a8] sm:$0xff]  ;;  %v34_v45 = vld [vmem:[%s839_s1 + $0x20] sm:$0xff] }
  0x10   :  { %228 = vmatpush.msra.mxu3 %v87_v26  ;;  %209 = vmatpush.msra.mxu2 %v70_v28  ;;  %v51_v43 = vld [vmem:[%s839_s1 + $0xa8] sm:$0xff]  ;;  %v82_v46 = vld [vmem:[%s839_s1 + $0x1a0] sm:$0xff]  ;;  %v65_v48 = vld [vmem:[%s839_s1 + $0x118] sm:$0xff] }
  0x11   :  { %188 = vmatpush.msra.mxu1 %v55_v27  ;;  %169 = vmatpush.msra.mxu0 %v38_v29  ;;  %v50_v47 = vld [vmem:[%s839_s1 + $0xa0] sm:$0xff]  ;;  %v33_v49 = vld [vmem:[%s839_s1 + $0x18] sm:$0xff]  ;;  %v64_v52 = vld [vmem:[%s839_s1 + $0x110] sm:$0xff] }
  0x12   :  { %229 = vmatpush.msra.mxu3 %v86_v30  ;;  %210 = vmatpush.msra.mxu2 %v69_v32  ;;  %v81_v50 = vld [vmem:[%s839_s1 + $0x198] sm:$0xff]  ;;  %v32_v53 = vld [vmem:[%s839_s1 + $0x10] sm:$0xff]  ;;  %v63_v56 = vld [vmem:[%s839_s1 + $0x108] sm:$0xff] }
  0x13   :  { %189 = vmatpush.msra.mxu1 %v54_v31  ;;  %170 = vmatpush.msra.mxu0 %v37_v33  ;;  %v49_v51 = vld [vmem:[%s839_s1 + $0x98] sm:$0xff]  ;;  %v80_v54 = vld [vmem:[%s839_s1 + $0x190] sm:$0xff]  ;;  %v31_v57 = vld [vmem:[%s839_s1 + $0x8] sm:$0xff] }
  0x14   :  { %230 = vmatpush.msra.mxu3 %v85_v34  ;;  %211 = vmatpush.msra.mxu2 %v68_v36  ;;  %v48_v55 = vld [vmem:[%s839_s1 + $0x90] sm:$0xff]  ;;  %v79_v58 = vld [vmem:[%s839_s1 + $0x188] sm:$0xff]  ;;  %v62_v60 = vld [vmem:[%s839_s1 + $0x100] sm:$0xff] }
  0x15   :  { %190 = vmatpush.msra.mxu1 %v53_v35  ;;  %171 = vmatpush.msra.mxu0 %v36_v37  ;;  %v47_v59 = vld [vmem:[%s839_s1 + $0x88] sm:$0xff]  ;;  %v30_v61 = vld [vmem:[%s839_s1] sm:$0xff]  ;;  %v141_v62 = vld [vmem:[%s839_s1 + $0x378] sm:$0xff] }
  0x16   :  { %231 = vmatpush.msra.mxu3 %v84_v38  ;;  %212 = vmatpush.msra.mxu2 %v67_v40  ;;  %v78_v63 = vld [vmem:[%s839_s1 + $0x180] sm:$0xff]  ;;  %v109_v0 = vld [vmem:[%s839_s1 + $0x278] sm:$0xff]  ;;  %v140_v2 = vld [vmem:[%s839_s1 + $0x370] sm:$0xff] }
  0x17   :  { %191 = vmatpush.msra.mxu1 %v52_v39  ;;  %172 = vmatpush.msra.mxu0 %v35_v41  ;;  %v157_v1 = vld [vmem:[%s839_s1 + $0x3f8] sm:$0xff]  ;;  %v46_v3 = vld [vmem:[%s839_s1 + $0x80] sm:$0xff]  ;;  %v108_v4 = vld [vmem:[%s839_s1 + $0x270] sm:$0xff] }
  0x18   :  { %232 = vmatpush.msra.mxu3 %v83_v42  ;;  %213 = vmatpush.msra.mxu2 %v66_v44  ;;  %v125_v5 = vld [vmem:[%s839_s1 + $0x2f8] sm:$0xff]  ;;  %v139_v6 = vld [vmem:[%s839_s1 + $0x368] sm:$0xff]  ;;  %v156_v7 = vld [vmem:[%s839_s1 + $0x3f0] sm:$0xff] }
  0x19   :  { %192 = vmatpush.msra.mxu1 %v51_v43  ;;  %173 = vmatpush.msra.mxu0 %v34_v45  ;;  %v107_v8 = vld [vmem:[%s839_s1 + $0x268] sm:$0xff]  ;;  %v124_v9 = vld [vmem:[%s839_s1 + $0x2f0] sm:$0xff]  ;;  %v138_v10 = vld [vmem:[%s839_s1 + $0x360] sm:$0xff] }
  0x1a   :  { %233 = vmatpush.msra.mxu3 %v82_v46  ;;  %214 = vmatpush.msra.mxu2 %v65_v48  ;;  %v155_v11 = vld [vmem:[%s839_s1 + $0x3e8] sm:$0xff]  ;;  %v106_v12 = vld [vmem:[%s839_s1 + $0x260] sm:$0xff]  ;;  %v137_v14 = vld [vmem:[%s839_s1 + $0x358] sm:$0xff] }
  0x1b   :  { %193 = vmatpush.msra.mxu1 %v50_v47  ;;  %174 = vmatpush.msra.mxu0 %v33_v49  ;;  %v123_v13 = vld [vmem:[%s839_s1 + $0x2e8] sm:$0xff]  ;;  %v154_v15 = vld [vmem:[%s839_s1 + $0x3e0] sm:$0xff]  ;;  %v105_v16 = vld [vmem:[%s839_s1 + $0x258] sm:$0xff] }
  0x1c   :  { %234 = vmatpush.msra.mxu3 %v81_v50  ;;  %215 = vmatpush.msra.mxu2 %v64_v52  ;;  %v122_v17 = vld [vmem:[%s839_s1 + $0x2e0] sm:$0xff]  ;;  %v136_v18 = vld [vmem:[%s839_s1 + $0x350] sm:$0xff]  ;;  %v153_v19 = vld [vmem:[%s839_s1 + $0x3d8] sm:$0xff] }
  0x1d   :  { %194 = vmatpush.msra.mxu1 %v49_v51  ;;  %175 = vmatpush.msra.mxu0 %v32_v53  ;;  %v104_v20 = vld [vmem:[%s839_s1 + $0x250] sm:$0xff]  ;;  %v121_v21 = vld [vmem:[%s839_s1 + $0x2d8] sm:$0xff]  ;;  %v135_v22 = vld [vmem:[%s839_s1 + $0x348] sm:$0xff] }
  0x1e   :  { %235 = vmatpush.msra.mxu3 %v80_v54  ;;  %216 = vmatpush.msra.mxu2 %v63_v56  ;;  %v152_v23 = vld [vmem:[%s839_s1 + $0x3d0] sm:$0xff]  ;;  %v103_v24 = vld [vmem:[%s839_s1 + $0x248] sm:$0xff]  ;;  %v134_v26 = vld [vmem:[%s839_s1 + $0x340] sm:$0xff] }
  0x1f   :  { %195 = vmatpush.msra.mxu1 %v48_v55  ;;  %176 = vmatpush.msra.mxu0 %v31_v57  ;;  %v120_v25 = vld [vmem:[%s839_s1 + $0x2d0] sm:$0xff]  ;;  %v151_v27 = vld [vmem:[%s839_s1 + $0x3c8] sm:$0xff]  ;;  %v102_v28 = vld [vmem:[%s839_s1 + $0x240] sm:$0xff] }
  0x20   :  { %236 = vmatpush.msra.mxu3 %v79_v58  ;;  %217 = vmatpush.msra.mxu2 %v62_v60  ;;  %v119_v29 = vld [vmem:[%s839_s1 + $0x2c8] sm:$0xff]  ;;  %v133_v30 = vld [vmem:[%s839_s1 + $0x338] sm:$0xff]  ;;  %v150_v31 = vld [vmem:[%s839_s1 + $0x3c0] sm:$0xff] }
  0x21   :  { %196 = vmatpush.msra.mxu1 %v47_v59  ;;  %177 = vmatpush.msra.mxu0 %v30_v61  ;;  %v101_v32 = vld [vmem:[%s839_s1 + $0x238] sm:$0xff]  ;;  %v118_v33 = vld [vmem:[%s839_s1 + $0x2c0] sm:$0xff] }
  0x22   :  { %282 = vmatpush.msrb.mxu2 %v141_v62  ;;  %237 = vmatpush.msra.mxu3 %v78_v63 }
  0x23   :  { %242 = vmatpush.msrb.mxu0 %v109_v0  ;;  %197 = vmatpush.msra.mxu1 %v46_v3 }
  0x24   :  { %302 = vmatpush.msrb.mxu3 %v157_v1  ;;  %283 = vmatpush.msrb.mxu2 %v140_v2 }
  0x25   :  { %243 = vmatpush.msrb.mxu0 %v108_v4  ;;  %262 = vmatpush.msrb.mxu1 %v125_v5 }
  0x26   :  { %284 = vmatpush.msrb.mxu2 %v139_v6  ;;  %303 = vmatpush.msrb.mxu3 %v156_v7 }
  0x27   :  { %244 = vmatpush.msrb.mxu0 %v107_v8  ;;  %263 = vmatpush.msrb.mxu1 %v124_v9 }
  0x28   :  { %285 = vmatpush.msrb.mxu2 %v138_v10  ;;  %304 = vmatpush.msrb.mxu3 %v155_v11 }
  0x29   :  { %245 = vmatpush.msrb.mxu0 %v106_v12  ;;  %264 = vmatpush.msrb.mxu1 %v123_v13 }
  0x2a   :  { %286 = vmatpush.msrb.mxu2 %v137_v14  ;;  %305 = vmatpush.msrb.mxu3 %v154_v15 }
  0x2b   :  { %246 = vmatpush.msrb.mxu0 %v105_v16  ;;  %265 = vmatpush.msrb.mxu1 %v122_v17 }
  0x2c   :  { %287 = vmatpush.msrb.mxu2 %v136_v18  ;;  %306 = vmatpush.msrb.mxu3 %v153_v19 }
  0x2d   :  { %247 = vmatpush.msrb.mxu0 %v104_v20  ;;  %266 = vmatpush.msrb.mxu1 %v121_v21 }
  0x2e   :  { %288 = vmatpush.msrb.mxu2 %v135_v22  ;;  %307 = vmatpush.msrb.mxu3 %v152_v23 }
  0x2f   :  { %248 = vmatpush.msrb.mxu0 %v103_v24  ;;  %267 = vmatpush.msrb.mxu1 %v120_v25 }
  0x30   :  { %289 = vmatpush.msrb.mxu2 %v134_v26  ;;  %308 = vmatpush.msrb.mxu3 %v151_v27 }
  0x31   :  { %11 = vsyncpa [#allocation4], 0  ;;  %249 = vmatpush.msrb.mxu0 %v102_v28  ;;  %268 = vmatpush.msrb.mxu1 %v119_v29  ;;  %v132_v34 = vld [vmem:[%s839_s1 + $0x330] sm:$0xff]  ;;  %v149_v35 = vld [vmem:[%s839_s1 + $0x3b8] sm:$0xff]  ;;  %vm328_vm0 = vcmask 261120   ;;  %v336_v29 = vlaneseq  ;;  %s387_s18 = smov [#allocation3]  }
  0x32   :  { %290 = vmatpush.msrb.mxu2 %v133_v30  ;;  %309 = vmatpush.msrb.mxu3 %v150_v31  ;;  %v100_v36 = vld [vmem:[%s839_s1 + $0x230] sm:$0xff]  ;;  %v117_v37 = vld [vmem:[%s839_s1 + $0x2b8] sm:$0xff]  ;;  %v131_v38 = vld [vmem:[%s839_s1 + $0x328] sm:$0xff]  ;;  %v333_v30 = vstv %s842_s4  ;;  %s347_s19 = sshll.u32 %s387_s18, 4  ;;  %s349_s22 = sshll.u32 %s843_s5, 4  ;;  %vm340_vm1 = vcmask 57344   ;;  %s348_s19 = int_to_ptr.vmem [resolvable:$true] %s347_s19  ;;  %s350_s22 = int_to_ptr.hbm [resolvable:$true] %s349_s22 }
  0x33   :  { %250 = vmatpush.msrb.mxu0 %v101_v32  ;;  %269 = vmatpush.msrb.mxu1 %v118_v33  ;;  %v148_v39 = vld [vmem:[%s839_s1 + $0x3b0] sm:$0xff]  ;;  %v99_v40 = vld [vmem:[%s839_s1 + $0x228] sm:$0xff]  ;;  %v130_v42 = vld [vmem:[%s839_s1 + $0x320] sm:$0xff]  ;;  %v337_v31 = vand.u32 127, %v336_v29 }
  0x34   :  { %291 = vmatpush.msrb.mxu2 %v132_v34  ;;  %310 = vmatpush.msrb.mxu3 %v149_v35  ;;  %v116_v41 = vld [vmem:[%s839_s1 + $0x2b0] sm:$0xff]  ;;  %v147_v43 = vld [vmem:[%s839_s1 + $0x3a8] sm:$0xff]  ;;  %v98_v45 = vld [vmem:[%s839_s1 + $0x220] sm:$0xff] }
  0x35   :  { %251 = vmatpush.msrb.mxu0 %v100_v36  ;;  %270 = vmatpush.msrb.mxu1 %v117_v37  ;;  %v24_v44 = vld [vmem:[%s838_s0 + $0x10] sm:$0xff]  ;;  %v115_v46 = vld [vmem:[%s839_s1 + $0x2a8] sm:$0xff]  ;;  %v129_v47 = vld [vmem:[%s839_s1 + $0x318] sm:$0xff] }
  0x36   :  { %292 = vmatpush.msrb.mxu2 %v131_v38  ;;  %311 = vmatpush.msrb.mxu3 %v148_v39  ;;  %v146_v48 = vld [vmem:[%s839_s1 + $0x3a0] sm:$0xff]  ;;  %v25_v50 = vld [vmem:[%s838_s0 + $0x18] sm:$0xff]  ;;  %v128_v53 = vld [vmem:[%s839_s1 + $0x310] sm:$0xff] }
  0x37   :  { %252 = vmatpush.msrb.mxu0 %v99_v40  ;;  %271 = vmatpush.msrb.mxu1 %v116_v41  ;;  %v22_v49 = vld [vmem:[%s838_s0] sm:$0xff]  ;;  %v97_v51 = vld [vmem:[%s839_s1 + $0x218] sm:$0xff]  ;;  %v23_v55 = vld [vmem:[%s838_s0 + $0x8] sm:$0xff] }
  0x38   :  { %293 = vmatpush.msrb.mxu2 %v130_v42  ;;  %312 = vmatpush.msrb.mxu3 %v147_v43  ;;  %v114_v52 = vld [vmem:[%s839_s1 + $0x2a0] sm:$0xff]  ;;  %v145_v54 = vld [vmem:[%s839_s1 + $0x398] sm:$0xff]  ;;  %v96_v56 = vld [vmem:[%s839_s1 + $0x210] sm:$0xff] }
  0x39   :  { %218 = vmatmul.f32.vlgmr.msra.gmra.mxu2 %v24_v44  ;;  %253 = vmatpush.msrb.mxu0 %v98_v45  ;;  %v113_v57 = vld [vmem:[%s839_s1 + $0x298] sm:$0xff]  ;;  %v127_v58 = vld [vmem:[%s839_s1 + $0x308] sm:$0xff]  ;;  %v144_v59 = vld [vmem:[%s839_s1 + $0x390] sm:$0xff] }
  0x3a   :  { %272 = vmatpush.msrb.mxu1 %v115_v46  ;;  %294 = vmatpush.msrb.mxu2 %v129_v47  ;;  %v95_v60 = vld [vmem:[%s839_s1 + $0x208] sm:$0xff]  ;;  %v112_v61 = vld [vmem:[%s839_s1 + $0x290] sm:$0xff]  ;;  %v126_v62 = vld [vmem:[%s839_s1 + $0x300] sm:$0xff] }
  0x3b   :  { %313 = vmatpush.msrb.mxu3 %v146_v48  ;;  %178 = vmatmul.f32.vlgmr.msra.gmra.mxu0 %v22_v49  ;;  %v143_v63 = vld [vmem:[%s839_s1 + $0x388] sm:$0xff]  ;;  %v28_v0 = vld [vmem:[%s838_s0 + $0x30] sm:$0xff]  ;;  %v94_v1 = vld [vmem:[%s839_s1 + $0x200] sm:$0xff] }
  0x3c   :  { %238 = vmatmul.f32.vlgmr.msra.gmra.mxu3 %v25_v50  ;;  %254 = vmatpush.msrb.mxu0 %v97_v51  ;;  %v111_v2 = vld [vmem:[%s839_s1 + $0x288] sm:$0xff]  ;;  %v142_v3 = vld [vmem:[%s839_s1 + $0x380] sm:$0xff]  ;;  %v29_v5 = vld [vmem:[%s838_s0 + $0x38] sm:$0xff] }
  0x3d   :  { %273 = vmatpush.msrb.mxu1 %v114_v52  ;;  %295 = vmatpush.msrb.mxu2 %v128_v53  ;;  %v26_v4 = vld [vmem:[%s838_s0 + $0x20] sm:$0xff]  ;;  %v27_v7 = vld [vmem:[%s838_s0 + $0x28] sm:$0xff] }
  0x3e   :  { %314 = vmatpush.msrb.mxu3 %v145_v54  ;;  %198 = vmatmul.f32.vlgmr.msra.gmra.mxu1 %v23_v55  ;;  %v110_v6 = vld [vmem:[%s839_s1 + $0x280] sm:$0xff] }
  0x3f   :  { %255 = vmatpush.msrb.mxu0 %v96_v56  ;;  %274 = vmatpush.msrb.mxu1 %v113_v57  ;;  %v359_v8 = vld [vmem:[%s840_s2] ss:$0 sm:$0xff] }
  0x40   :  { %296 = vmatpush.msrb.mxu2 %v127_v58  ;;  %315 = vmatpush.msrb.mxu3 %v144_v59  ;;  %v360_v25 = vld [vmem:[%s841_s3] ss:$0 sm:$0xff] }
  0x41   :  { %256 = vmatpush.msrb.mxu0 %v95_v60  ;;  %275 = vmatpush.msrb.mxu1 %v112_v61 }
  0x42   :  { %297 = vmatpush.msrb.mxu2 %v126_v62  ;;  %316 = vmatpush.msrb.mxu3 %v143_v63 }
  0x43   :  { %298 = vmatmul.f32.vlgmr.msrb.gmra.mxu2 %v28_v0  ;;  %257 = vmatpush.msrb.mxu0 %v94_v1 }
  0x44   :  { %276 = vmatpush.msrb.mxu1 %v111_v2  ;;  %317 = vmatpush.msrb.mxu3 %v142_v3 }
  0x45   :  { %258 = vmatmul.f32.vlgmr.msrb.gmra.mxu0 %v26_v4  ;;  %318 = vmatmul.f32.vlgmr.msrb.gmra.mxu3 %v29_v5 }
  0x46   :  { %277 = vmatpush.msrb.mxu1 %v110_v6 }
  0x47   :  { %278 = vmatmul.f32.vlgmr.msrb.gmra.mxu1 %v27_v7 }
  0xb8   :  { %v179_v9 = vpop.f32.mrf.mxu0 }
  0xb9   :  { %v180_v10 = vadd.f32 %v359_v8, %v179_v9 }
  0xbb   :  { %v199_v11 = vpop.f32.mrf.mxu1 }
  0xbc   :  { %v200_v12 = vadd.f32 %v199_v11, %v180_v10  ;;  %v219_v13 = vpop.f32.mrf.mxu2 }
  0xbe   :  { %v220_v14 = vadd.f32 %v219_v13, %v200_v12 }
  0xbf   :  { %v239_v15 = vpop.f32.mrf.mxu3 }
  0xc0   :  { %v240_v16 = vadd.f32 %v239_v15, %v220_v14 }
  0xc2   :  { %v259_v17 = vpop.f32.mrf.mxu0 }
  0xc3   :  { %v260_v18 = vadd.f32 %v259_v17, %v240_v16 }
  0xc4   :  { %v279_v19 = vpop.f32.mrf.mxu1 }
  0xc5   :  { %v280_v20 = vadd.f32 %v279_v19, %v260_v18 }
  0xc6   :  { %v299_v21 = vpop.f32.mrf.mxu2 }
  0xc7   :  { %v300_v22 = vadd.f32 %v299_v21, %v280_v20 }
  0xc8   :  { %v319_v23 = vpop.f32.mrf.mxu3 }
  0xc9   :  { %v320_v24 = vadd.f32 %v319_v23, %v300_v22 }
  0xcb   :  { %v322_v26 = vmax.f32 %v320_v24, 0.0 }
  0xcd   :  { %v327_v27 = vmul.f32 %v360_v25, %v322_v26 }
  0xcf   :  { %v329_v28 = vsel %vm328_vm0, %v327_v27, 0.0 }
  0xd0   :  { %330 = vadd.xlane.f32.xlu0 %v329_v28 }
 0x143   :  { %v331_v32 = vpop.xlane.xlu0 %330 }
 0x144   :  { %v334_v33 = vadd.f32 %v333_v30, %v331_v32 }
 0x146   :  { %v338_v34 = vperm.slane %v334_v33, %v337_v31 }
 0x148   :  { %341 = vst.msk [vmem:[#allocation3] sm:$0x1] %vm340_vm1, %v338_v34 }
 0x149   :  { %352 = dma.vmem_to_hbm [thread:$0]  %s348_s19, 16, %s350_s22, [#allocation4]  }
 0x14a   :  { %385 = dma.done.wait [#allocation4], 16  }
 0x14b   :  { %386 = vsyncadd [#allocation4], 4294967280 }
 0x14c   :  { %357 = vsyncpa [#allocation4], 1 }

</bundles_post_ra>
